<compile_context>
chip_gen: v7x
topology: tpu7x:2x2x1
jax: 0.10.0
libtpu: 0.0.40
codegen_flags: <defaults>
</compile_context>

<pallas_src>
import functools

import jax
import jax.numpy as jnp
import numpy as np
from jax.experimental import pallas as pl
from jax.experimental.pallas import tpu as pltpu

_LANES = 128
_NEG = -1e30


# --------------------------------------------------------------------------
# Weight packing (call ONCE per model, cache the result across forwards).
# --------------------------------------------------------------------------
def pack_weights(params):
    """Build one fully lane-dense [R,128] f32 weight slab + layout metadata."""
    f32 = jnp.float32
    F, H = params["w1"].shape
    H2 = params["l2w"].shape[1]
    C = params["l3w"].shape[1]
    K = _LANES  # padded contraction dim for every weight block

    def pad_block(w, rows):
        r, c = w.shape
        return jnp.zeros((rows, _LANES), f32).at[:r, :c].set(jnp.asarray(w, f32))

    w1 = pad_block(params["w1"], K)        # [128,128]
    w2 = pad_block(params["w2"], K)        # [128,128]
    w3 = pad_block(params["w3"], K)        # [128,128]
    # lin1 fused: feat = [gmax_sum (128 lanes) | gmean_sum (128 lanes)] -> 256 rows
    lin1 = jnp.zeros((2 * K, _LANES), f32)
    lin1 = lin1.at[:H, :H].set(jnp.asarray(params["l1a"], f32))        # gmp half
    lin1 = lin1.at[K:K + H, :H].set(jnp.asarray(params["l1b"], f32))   # gap half
    l2w = pad_block(params["l2w"], K)      # [128,128]
    l3w = pad_block(params["l3w"], K)      # [128,128]
    # All biases co-packed in one 8-row block.  Row 5 (lin3 bias) has its
    # padded class lanes set to -1e30 so log-softmax over 128 lanes is exact.
    biases = jnp.zeros((8, _LANES), f32)
    biases = biases.at[0, :H].set(jnp.asarray(params["b1"], f32).reshape(-1))
    biases = biases.at[1, :H].set(jnp.asarray(params["b2"], f32).reshape(-1))
    biases = biases.at[2, :H].set(jnp.asarray(params["b3"], f32).reshape(-1))
    biases = biases.at[3, :H].set(jnp.asarray(params["l1bias"], f32).reshape(-1))
    biases = biases.at[4, :H2].set(jnp.asarray(params["l2b"], f32).reshape(-1))
    l3b_row = jnp.full((_LANES,), _NEG, f32).at[:C].set(
        jnp.asarray(params["l3b"], f32).reshape(-1))
    biases = biases.at[5].set(l3b_row)

    names = ("w1", "w2", "w3", "lin1", "l2w", "l3w", "bias")
    blocks = (w1, w2, w3, lin1, l2w, l3w, biases)
    layout, off = {}, 0
    for name, blk in zip(names, blocks):
        layout[name] = (off, blk.shape[0])
        off += blk.shape[0]
    slab = jnp.concatenate(blocks, axis=0)          # [904, 128] ~ 452 KB
    meta = dict(layout=layout, num_classes=C)
    return slab, meta


# --------------------------------------------------------------------------
# Per-call data packing: x, adj, additive max-mask, scaled mean mask -> 1 slab.
# --------------------------------------------------------------------------
def _pack_data(x, adj, batch, num_graphs):
    N, F = x.shape
    B = num_graphs
    assert N % 8 == 0 and N <= _LANES and F <= _LANES and B <= _LANES
    mask = (batch[None, :] == jnp.arange(B, dtype=batch.dtype)[:, None]
            ).astype(jnp.float32)                            # [B, N]
    cnt = jnp.maximum(jnp.sum(mask, axis=1, keepdims=True), 1.0)
    mmean = mask / cnt                                       # gmean = mmean @ h
    addmask = (mask.T - 1.0) * -_NEG                         # [N, B]: 0 / -1e30
    rows_mm = -(-B // 8) * 8
    slab = jnp.zeros((3 * N + rows_mm, _LANES), jnp.float32)
    slab = slab.at[:N, :F].set(x.astype(jnp.float32))
    slab = slab.at[N:2 * N, :N].set(adj.astype(jnp.float32))
    slab = slab.at[2 * N:3 * N, :B].set(addmask)
    slab = slab.at[3 * N:3 * N + B, :N].set(mmean)
    data_layout = (0, N, 2 * N, 3 * N)                       # x, adj, addmask, mmean
    return slab, data_layout


# --------------------------------------------------------------------------
# Fused kernel.
# --------------------------------------------------------------------------
def _net_kernel(layout, data_layout, num_graphs, num_nodes,
                wslab_ref, dslab_ref, out_ref):
    f32 = jnp.float32
    N, B, L = num_nodes, num_graphs, _LANES
    xo, ao, mo, go = data_layout

    def w(name):
        off, rows = layout[name]
        return wslab_ref[off:off + rows, :]          # full-lane, tile-aligned

    def bias(i):
        off, _ = layout["bias"]
        return wslab_ref[off + i:off + i + 1, :]     # [1,128] row inside one tile

    x = dslab_ref[xo:xo + N, :]                      # [N,128] (F real lanes)
    adj = dslab_ref[ao:ao + N, :N]                   # [N,N]
    mmean = dslab_ref[go:go + B, :N]                 # [B,N]

    # Layer 1: (adj @ x) @ W1 + b1 (contract small F first), relu.
    ax = jnp.dot(adj, x, preferred_element_type=f32)
    h1 = jnp.maximum(
        jnp.dot(ax, w("w1"), preferred_element_type=f32) + bias(0), 0.0)

    def gconv(h, wname, bidx):
        s = jnp.dot(h, w(wname), preferred_element_type=f32)
        return jnp.maximum(
            jnp.dot(adj, s, preferred_element_type=f32) + bias(bidx), 0.0)

    h2 = gconv(h1, "w2", 1)
    h3 = gconv(h2, "w3", 2)

    # Fused max readout: one lane-concat, one masked max per graph.
    hcat = jnp.concatenate([h1, h2, h3], axis=1)     # [N, 3*128]
    rows = []
    for b in range(B):                               # B is static & tiny
        am = dslab_ref[mo:mo + N, b:b + 1]           # [N,1] additive {0,-1e30}
        rows.append(jnp.max(hcat + am, axis=0, keepdims=True))   # [1, 3*128]
    gm = jnp.concatenate(rows, axis=0)               # [B, 3*128]
    gmax_sum = gm[:, :L] + gm[:, L:2 * L] + gm[:, 2 * L:]         # [B, 128]

    # Mean readout fused by linearity: a1+a2+a3 == mmean @ (h1+h2+h3).
    gmean_sum = jnp.dot(mmean, h1 + h2 + h3, preferred_element_type=f32)

    # lin1 as ONE matmul on the lane-concat of both readouts.
    feat = jnp.concatenate([gmax_sum, gmean_sum], axis=1)         # [B, 256]
    z = jnp.maximum(
        jnp.dot(feat, w("lin1"), preferred_element_type=f32) + bias(3), 0.0)
    # TODO(synk): F.dropout is identity here (inference / training=False).
    z = jnp.maximum(
        jnp.dot(z, w("l2w"), preferred_element_type=f32) + bias(4), 0.0)
    logits = jnp.dot(z, w("l3w"), preferred_element_type=f32) + bias(5)

    # log_softmax over 128 lanes; padded class lanes carry -1e30 bias -> exp=0.
    m = jnp.max(logits, axis=-1, keepdims=True)
    lse = m + jnp.log(jnp.sum(jnp.exp(logits - m), axis=-1, keepdims=True))
    out_ref[...] = logits - lse


def run_net(x, adj, batch, packed, num_graphs):
    """Forward pass. `packed` = pack_weights(params), cached by the caller."""
    wslab, meta = packed
    dslab, dlayout = _pack_data(x, adj, batch, num_graphs)
    B, N = num_graphs, x.shape[0]

    vmem = pl.BlockSpec(memory_space=pltpu.MemorySpace.VMEM)
    kernel = functools.partial(_net_kernel, meta["layout"], dlayout, B, N)
    out = pl.pallas_call(
        kernel,
        out_shape=jax.ShapeDtypeStruct((B, _LANES), jnp.float32),  # lane-dense
        in_specs=[vmem, vmem],
        out_specs=vmem,
    )(wslab, dslab)
    return out[:, :meta["num_classes"]]


# --------------------------------------------------------------------------
# Plain-JAX reference of the original forward pass (correctness check).
# --------------------------------------------------------------------------
def reference(x, adj, batch, params, num_graphs):
    B = num_graphs
    mask = (batch[None, :] == jnp.arange(B, dtype=batch.dtype)[:, None]
            ).astype(jnp.float32)
    cnt = jnp.maximum(mask.sum(1, keepdims=True), 1.0)

    def gconv(h, w, b):
        return jax.nn.relu(adj @ (h @ w) + b)

    def readout(h):
        masked = jnp.where(mask[:, :, None] > 0, h[None], _NEG)
        return masked.max(1), (mask @ h) / cnt

    h1 = gconv(x, params["w1"], params["b1"]); m1, a1 = readout(h1)
    h2 = gconv(h1, params["w2"], params["b2"]); m2, a2 = readout(h2)
    h3 = gconv(h2, params["w3"], params["b3"]); m3, a3 = readout(h3)
    z = ((m1 + m2 + m3) @ params["l1a"]
         + (a1 + a2 + a3) @ params["l1b"] + params["l1bias"])
    z = jax.nn.relu(z)
    z = jax.nn.relu(z @ params["l2w"] + params["l2b"])
    logits = z @ params["l3w"] + params["l3b"]
    return jax.nn.log_softmax(logits, axis=-1)


if __name__ == "__main__":
    # N=16 nodes total, B=2 graphs, num_features=4, nhid=32, num_classes=3
    N, F, H, C, B = 16, 4, 32, 3, 2

    key = jax.random.PRNGKey(0)
    keys = jax.random.split(key, 16)

    x = jax.random.normal(keys[0], (N, F), jnp.float32)
    a = (jax.random.uniform(keys[1], (N, N)) < 0.3).astype(jnp.float32)
    adj = jnp.minimum(jnp.maximum(a, a.T) + jnp.eye(N, dtype=jnp.float32), 1.0)
    batch = jnp.concatenate([
        jnp.zeros((N // 2,), jnp.int32),
        jnp.ones((N - N // 2,), jnp.int32)])

    def uni(k, shape, fan_in):
        bound = 1.0 / np.sqrt(float(fan_in))
        return jax.random.uniform(k, shape, jnp.float32, -bound, bound)

    params = dict(
        w1=uni(keys[2], (F, H), F),        b1=uni(keys[3], (1, H), F),
        w2=uni(keys[4], (H, H), H),        b2=uni(keys[5], (1, H), H),
        w3=uni(keys[6], (H, H), H),        b3=uni(keys[7], (1, H), H),
    )
    lw1 = uni(keys[8], (2 * H, H), 2 * H)            # lin1 weight [2H, H] (pre-T)
    params["l1a"] = lw1[:H]                           # acts on gmp half
    params["l1b"] = lw1[H:]                           # acts on gap half
    params["l1bias"] = uni(keys[9], (1, H), 2 * H)
    params["l2w"] = uni(keys[10], (H, H // 2), H)
    params["l2b"] = uni(keys[11], (1, H // 2), H)
    params["l3w"] = uni(keys[12], (H // 2, C), H // 2)
    params["l3b"] = uni(keys[13], (1, C), H // 2)

    packed = pack_weights(params)        # built ONCE; reused across forwards
    out = run_net(x, adj, batch, packed, B)
    jax.block_until_ready(out)

    ref = reference(x, adj, batch, params, B)
    assert out.shape == (B, C)
    np.testing.assert_allclose(np.asarray(out), np.asarray(ref),
                               rtol=1e-4, atol=1e-4)
    print("KERNEL_OK")
</pallas_src>

<mosaic_0001>
module attributes {stable_mosaic.version = 11 : i64} {
  func.func @_net_kernel(%arg0: memref<904x128xf32, #tpu.memory_space<vmem>>, %arg1: memref<56x128xf32, #tpu.memory_space<vmem>>, %arg2: memref<2x128xf32, #tpu.memory_space<vmem>>) attributes {dimension_semantics = [], scalar_prefetch = 0 : i64, scratch_operands = 0 : i64, tpu.core_type = #tpu.core_type<tc>} {
    %c0 = arith.constant 0 : index
    %c0_0 = arith.constant 0 : index
    %0 = vector.load %arg1[%c0, %c0_0] : memref<56x128xf32, #tpu.memory_space<vmem>>, vector<16x128xf32>
    %c16 = arith.constant 16 : index
    %c0_1 = arith.constant 0 : index
    %1 = vector.load %arg1[%c16, %c0_1] : memref<56x128xf32, #tpu.memory_space<vmem>>, vector<16x16xf32>
    %c48 = arith.constant 48 : index
    %c0_2 = arith.constant 0 : index
    %2 = vector.load %arg1[%c48, %c0_2] : memref<56x128xf32, #tpu.memory_space<vmem>>, vector<2x16xf32>
    %cst = arith.constant dense<0.000000e+00> : vector<16x128xf32>
    %3 = tpu.matmul %1, %0, %cst {dimension_numbers = #tpu.dot_dimension_numbers<[1], [0], [0], [1], [0, 0, 1, 1], [], []>} : vector<16x16xf32>, vector<16x128xf32>, vector<16x128xf32> -> vector<16x128xf32>
    %c0_3 = arith.constant 0 : index
    %c0_4 = arith.constant 0 : index
    %4 = vector.load %arg0[%c0_3, %c0_4] : memref<904x128xf32, #tpu.memory_space<vmem>>, vector<128x128xf32>
    %cst_5 = arith.constant dense<0.000000e+00> : vector<16x128xf32>
    %5 = tpu.matmul %3, %4, %cst_5 {dimension_numbers = #tpu.dot_dimension_numbers<[1], [0], [0], [1], [0, 0, 1, 1], [], []>} : vector<16x128xf32>, vector<128x128xf32>, vector<16x128xf32> -> vector<16x128xf32>
    %c896 = arith.constant 896 : index
    %c0_6 = arith.constant 0 : index
    %6 = vector.load %arg0[%c896, %c0_6] : memref<904x128xf32, #tpu.memory_space<vmem>>, vector<1x128xf32>
    %7 = vector.broadcast %6 : vector<1x128xf32> to vector<16x128xf32>
    %8 = arith.addf %5, %7 : vector<16x128xf32>
    %cst_7 = arith.constant 0.000000e+00 : f32
    %9 = vector.broadcast %cst_7 : f32 to vector<16x128xf32>
    %10 = arith.maximumf %8, %9 : vector<16x128xf32>
    %c128 = arith.constant 128 : index
    %c0_8 = arith.constant 0 : index
    %11 = vector.load %arg0[%c128, %c0_8] : memref<904x128xf32, #tpu.memory_space<vmem>>, vector<128x128xf32>
    %cst_9 = arith.constant dense<0.000000e+00> : vector<16x128xf32>
    %12 = tpu.matmul %10, %11, %cst_9 {dimension_numbers = #tpu.dot_dimension_numbers<[1], [0], [0], [1], [0, 0, 1, 1], [], []>} : vector<16x128xf32>, vector<128x128xf32>, vector<16x128xf32> -> vector<16x128xf32>
    %cst_10 = arith.constant dense<0.000000e+00> : vector<16x128xf32>
    %13 = tpu.matmul %1, %12, %cst_10 {dimension_numbers = #tpu.dot_dimension_numbers<[1], [0], [0], [1], [0, 0, 1, 1], [], []>} : vector<16x16xf32>, vector<16x128xf32>, vector<16x128xf32> -> vector<16x128xf32>
    %c897 = arith.constant 897 : index
    %c0_11 = arith.constant 0 : index
    %14 = vector.load %arg0[%c897, %c0_11] : memref<904x128xf32, #tpu.memory_space<vmem>>, vector<1x128xf32>
    %15 = vector.broadcast %14 : vector<1x128xf32> to vector<16x128xf32>
    %16 = arith.addf %13, %15 : vector<16x128xf32>
    %cst_12 = arith.constant 0.000000e+00 : f32
    %17 = vector.broadcast %cst_12 : f32 to vector<16x128xf32>
    %18 = arith.maximumf %16, %17 : vector<16x128xf32>
    %c256 = arith.constant 256 : index
    %c0_13 = arith.constant 0 : index
    %19 = vector.load %arg0[%c256, %c0_13] : memref<904x128xf32, #tpu.memory_space<vmem>>, vector<128x128xf32>
    %cst_14 = arith.constant dense<0.000000e+00> : vector<16x128xf32>
    %20 = tpu.matmul %18, %19, %cst_14 {dimension_numbers = #tpu.dot_dimension_numbers<[1], [0], [0], [1], [0, 0, 1, 1], [], []>} : vector<16x128xf32>, vector<128x128xf32>, vector<16x128xf32> -> vector<16x128xf32>
    %cst_15 = arith.constant dense<0.000000e+00> : vector<16x128xf32>
    %21 = tpu.matmul %1, %20, %cst_15 {dimension_numbers = #tpu.dot_dimension_numbers<[1], [0], [0], [1], [0, 0, 1, 1], [], []>} : vector<16x16xf32>, vector<16x128xf32>, vector<16x128xf32> -> vector<16x128xf32>
    %c898 = arith.constant 898 : index
    %c0_16 = arith.constant 0 : index
    %22 = vector.load %arg0[%c898, %c0_16] : memref<904x128xf32, #tpu.memory_space<vmem>>, vector<1x128xf32>
    %23 = vector.broadcast %22 : vector<1x128xf32> to vector<16x128xf32>
    %24 = arith.addf %21, %23 : vector<16x128xf32>
    %cst_17 = arith.constant 0.000000e+00 : f32
    %25 = vector.broadcast %cst_17 : f32 to vector<16x128xf32>
    %26 = arith.maximumf %24, %25 : vector<16x128xf32>
    %27 = tpu.concatenate %10, %18, %26 in 1 : vector<16x128xf32>, vector<16x128xf32>, vector<16x128xf32> -> vector<16x384xf32>
    %c32 = arith.constant 32 : index
    %c0_18 = arith.constant 0 : index
    %28 = vector.load %arg1[%c32, %c0_18] : memref<56x128xf32, #tpu.memory_space<vmem>>, vector<16x1xf32>
    %29 = vector.broadcast %28 : vector<16x1xf32> to vector<16x384xf32>
    %30 = arith.addf %27, %29 : vector<16x384xf32>
    %cst_19 = arith.constant dense<0xFF800000> : vector<384xf32>
    %31 = vector.multi_reduction <maximumf>, %30, %cst_19 [0] : vector<16x384xf32> to vector<384xf32>
    %32 = vector.shape_cast %31 : vector<384xf32> to vector<1x384xf32>
    %c32_20 = arith.constant 32 : index
    %c1 = arith.constant 1 : index
    %33 = vector.load %arg1[%c32_20, %c1] : memref<56x128xf32, #tpu.memory_space<vmem>>, vector<16x1xf32>
    %34 = vector.broadcast %33 : vector<16x1xf32> to vector<16x384xf32>
    %35 = arith.addf %27, %34 : vector<16x384xf32>
    %cst_21 = arith.constant dense<0xFF800000> : vector<384xf32>
    %36 = vector.multi_reduction <maximumf>, %35, %cst_21 [0] : vector<16x384xf32> to vector<384xf32>
    %37 = vector.shape_cast %36 : vector<384xf32> to vector<1x384xf32>
    %38 = tpu.concatenate %32, %37 in 0 : vector<1x384xf32>, vector<1x384xf32> -> vector<2x384xf32>
    %39 = vector.extract_strided_slice %38 {offsets = [0, 0], sizes = [2, 128], strides = [1, 1]} : vector<2x384xf32> to vector<2x128xf32>
    %40 = vector.extract_strided_slice %38 {offsets = [0, 128], sizes = [2, 128], strides = [1, 1]} : vector<2x384xf32> to vector<2x128xf32>
    %41 = arith.addf %39, %40 : vector<2x128xf32>
    %42 = vector.extract_strided_slice %38 {offsets = [0, 256], sizes = [2, 128], strides = [1, 1]} : vector<2x384xf32> to vector<2x128xf32>
    %43 = arith.addf %41, %42 : vector<2x128xf32>
    %44 = arith.addf %10, %18 : vector<16x128xf32>
    %45 = arith.addf %44, %26 : vector<16x128xf32>
    %cst_22 = arith.constant dense<0.000000e+00> : vector<2x128xf32>
    %46 = tpu.matmul %2, %45, %cst_22 {dimension_numbers = #tpu.dot_dimension_numbers<[1], [0], [0], [1], [0, 0, 1, 1], [], []>} : vector<2x16xf32>, vector<16x128xf32>, vector<2x128xf32> -> vector<2x128xf32>
    %47 = tpu.concatenate %43, %46 in 1 : vector<2x128xf32>, vector<2x128xf32> -> vector<2x256xf32>
    %c384 = arith.constant 384 : index
    %c0_23 = arith.constant 0 : index
    %48 = vector.load %arg0[%c384, %c0_23] : memref<904x128xf32, #tpu.memory_space<vmem>>, vector<256x128xf32>
    %cst_24 = arith.constant dense<0.000000e+00> : vector<2x128xf32>
    %49 = tpu.matmul %47, %48, %cst_24 {dimension_numbers = #tpu.dot_dimension_numbers<[1], [0], [0], [1], [0, 0, 1, 1], [], []>} : vector<2x256xf32>, vector<256x128xf32>, vector<2x128xf32> -> vector<2x128xf32>
    %c899 = arith.constant 899 : index
    %c0_25 = arith.constant 0 : index
    %50 = vector.load %arg0[%c899, %c0_25] : memref<904x128xf32, #tpu.memory_space<vmem>>, vector<1x128xf32>
    %51 = vector.broadcast %50 : vector<1x128xf32> to vector<2x128xf32>
    %52 = arith.addf %49, %51 : vector<2x128xf32>
    %cst_26 = arith.constant 0.000000e+00 : f32
    %53 = vector.broadcast %cst_26 : f32 to vector<2x128xf32>
    %54 = arith.maximumf %52, %53 : vector<2x128xf32>
    %c640 = arith.constant 640 : index
    %c0_27 = arith.constant 0 : index
    %55 = vector.load %arg0[%c640, %c0_27] : memref<904x128xf32, #tpu.memory_space<vmem>>, vector<128x128xf32>
    %cst_28 = arith.constant dense<0.000000e+00> : vector<2x128xf32>
    %56 = tpu.matmul %54, %55, %cst_28 {dimension_numbers = #tpu.dot_dimension_numbers<[1], [0], [0], [1], [0, 0, 1, 1], [], []>} : vector<2x128xf32>, vector<128x128xf32>, vector<2x128xf32> -> vector<2x128xf32>
    %c900 = arith.constant 900 : index
    %c0_29 = arith.constant 0 : index
    %57 = vector.load %arg0[%c900, %c0_29] : memref<904x128xf32, #tpu.memory_space<vmem>>, vector<1x128xf32>
    %58 = vector.broadcast %57 : vector<1x128xf32> to vector<2x128xf32>
    %59 = arith.addf %56, %58 : vector<2x128xf32>
    %cst_30 = arith.constant 0.000000e+00 : f32
    %60 = vector.broadcast %cst_30 : f32 to vector<2x128xf32>
    %61 = arith.maximumf %59, %60 : vector<2x128xf32>
    %c768 = arith.constant 768 : index
    %c0_31 = arith.constant 0 : index
    %62 = vector.load %arg0[%c768, %c0_31] : memref<904x128xf32, #tpu.memory_space<vmem>>, vector<128x128xf32>
    %cst_32 = arith.constant dense<0.000000e+00> : vector<2x128xf32>
    %63 = tpu.matmul %61, %62, %cst_32 {dimension_numbers = #tpu.dot_dimension_numbers<[1], [0], [0], [1], [0, 0, 1, 1], [], []>} : vector<2x128xf32>, vector<128x128xf32>, vector<2x128xf32> -> vector<2x128xf32>
    %c901 = arith.constant 901 : index
    %c0_33 = arith.constant 0 : index
    %64 = vector.load %arg0[%c901, %c0_33] : memref<904x128xf32, #tpu.memory_space<vmem>>, vector<1x128xf32>
    %65 = vector.broadcast %64 : vector<1x128xf32> to vector<2x128xf32>
    %66 = arith.addf %63, %65 : vector<2x128xf32>
    %cst_34 = arith.constant dense<0xFF800000> : vector<2xf32>
    %67 = vector.multi_reduction <maximumf>, %66, %cst_34 [1] : vector<2x128xf32> to vector<2xf32>
    %68 = vector.shape_cast %67 : vector<2xf32> to vector<2x1xf32>
    %69 = vector.broadcast %68 : vector<2x1xf32> to vector<2x128xf32>
    %70 = arith.subf %66, %69 : vector<2x128xf32>
    %71 = math.exp %70 : vector<2x128xf32>
    %cst_35 = arith.constant dense<0.000000e+00> : vector<2xf32>
    %72 = vector.multi_reduction <add>, %71, %cst_35 [1] : vector<2x128xf32> to vector<2xf32>
    %73 = vector.shape_cast %72 : vector<2xf32> to vector<2x1xf32>
    %74 = math.log %73 : vector<2x1xf32>
    %75 = arith.addf %68, %74 : vector<2x1xf32>
    %76 = vector.broadcast %75 : vector<2x1xf32> to vector<2x128xf32>
    %77 = arith.subf %66, %76 : vector<2x128xf32>
    %c0_36 = arith.constant 0 : index
    %c0_37 = arith.constant 0 : index
    %78 = vector.load %arg2[%c0_36, %c0_37] : memref<2x128xf32, #tpu.memory_space<vmem>>, vector<2x128xf32>
    tpu.vector_store %arg2[%c0_36, %c0_37], %77 {strides = array<i32>} : memref<2x128xf32, #tpu.memory_space<vmem>>, vector<2x128xf32>,
    return
  }
}

</mosaic_0001>

<bundles_post_ra>
// kernel: tpu_custom_call.1
= control target key start
LH: loop header
LB: loop body
LE: loop exit
PB: predicated region body
PF: predicated region fallthrough
CT: control target
= control target key end

     0   :  { %7 = vsyncpa [#allocation3], 0  ;;  %s1813_s0 = inlined_call_operand.hbm [shape: f32[904,128], index: 0, kind: input, shape index: {}]   ;;  %s1814_s1 = inlined_call_operand.hbm [shape: f32[56,128], index: 1, kind: input, shape index: {}]   ;;  %s1815_s2 = inlined_call_operand.hbm [shape: f32[2,128], index: 2, kind: output, shape index: {}]  }
   0x1   :  { %8 = vsyncpa [#allocation6], 0 }
   0x2   :  { %9 = vsyncpa [#allocation4], 0  ;;  %s1684_s9 = smov [#allocation2]   ;;  %s1612_s13 = scalar_lea.hbm %s1813_s0, 14464 }
   0x3   :  { %s15_s10 = sshll.u32 %s1684_s9, 4  ;;  %p1613_p0 = scmp.ne.s32.totalorder %s1813_s0, %s1612_s13  ;;  %s16_s10 = int_to_ptr.vmem [resolvable:$true] %s15_s10 }
   0x4   :  { %p1616_p1 = scmp.lt.u32.totalorder %s1612_s13, %s1813_s0 }
   0x6   :  { %p1618_p2 = pnand %p1616_p1, %p1613_p0 }
   0x8   :  { %1621 = shalt.err (!%p1618_p2)
}
   0x9   :  { %s1622_s18 = scalar_lea.vmem %s16_s10, 14464  ;;  %p1627_p4 = scmp.lt.s32.totalorder %s16_s10, %s16_s10 }
   0xa   :  { %p1623_p3 = scmp.ne.s32.totalorder %s16_s10, %s1622_s18  ;;  %p1628_p5 = scmp.lt.s32.totalorder %s1622_s18, %s1622_s18 }
   0xc   :  { %p1629_p6 = por %p1628_p5, %p1627_p4 }
   0xe   :  { %p1630_p7 = pnand %p1629_p6, %p1623_p3 }
  0x10   :  { %1633 = shalt.err (!%p1630_p7)
}
  0x11   :  { %s1685_s19 = smov 128   ;;  %s1686_s20 = smov 8  }
  0x12   :  { %21 = dma.hbm_to_vmem [thread:$0]  %s1813_s0, 14464, %s16_s10, [#allocation3], %s1685_s19, %s1685_s19, %s1686_s20  }
  0x13   :  { %s1687_s23 = smov [#allocation5]   ;;  %s1634_s27 = scalar_lea.hbm %s1814_s1, 896 }
  0x14   :  { %s27_s24 = sshll.u32 %s1687_s23, 4  ;;  %p1635_p8 = scmp.ne.s32.totalorder %s1814_s1, %s1634_s27  ;;  %s28_s24 = int_to_ptr.vmem [resolvable:$true] %s27_s24 }
  0x15   :  { %p1638_p9 = scmp.lt.u32.totalorder %s1634_s27, %s1814_s1 }
  0x17   :  { %p1640_p10 = pnand %p1638_p9, %p1635_p8 }
  0x19   :  { %1643 = shalt.err (!%p1640_p10)
}
  0x1a   :  { %s1644_s4 = scalar_lea.vmem %s28_s24, 896  ;;  %p1649_p12 = scmp.lt.s32.totalorder %s28_s24, %s28_s24 }
  0x1b   :  { %p1645_p11 = scmp.ne.s32.totalorder %s28_s24, %s1644_s4  ;;  %p1650_p13 = scmp.lt.s32.totalorder %s1644_s4, %s1644_s4 }
  0x1d   :  { %p1651_p0 = por %p1650_p13, %p1649_p12 }
  0x1f   :  { %p1652_p1 = pnand %p1651_p0, %p1645_p11 }
  0x21   :  { %1655 = shalt.err (!%p1652_p1)
}
  0x22   :  { %33 = dma.hbm_to_vmem [thread:$0]  %s1814_s1, 896, %s28_s24, [#allocation6], %s1685_s19, %s1685_s19, %s1686_s20  }
  0x23   :  { %1678 = dma.done.wait [#allocation3], 14464  }
  0x24   :  { %1679 = vsyncadd [#allocation3], 4294952832 }
  0x25   :  { %1680 = dma.done.wait [#allocation6], 896  }
  0x26   :  { %1681 = vsyncadd [#allocation6], 4294966400  ;;  %vm45_vm0 = vcmask 130048   ;;  %v40_v0 = vld [vmem:[#allocation5] sm:$0xff]  ;;  %v41_v1 = vld [vmem:[#allocation5 + $0x8] sm:$0xff]  ;;  %v1688_v31 = vmov 1  }
  0x27   :  { %v1733_v2 = vld [vmem:[#allocation5 + $0x10] sm:$0xff]  ;;  %v1404_v3 = vpack.c.bf16 %v41_v1, %v40_v0  ;;  %v127_v4 = vld [vmem:[#allocation2] sm:$0xff]  ;;  %v128_v5 = vld [vmem:[#allocation2 + $0x8] sm:$0xff]  ;;  %1606 = vset.pattern.permute.xlu1 %v1688_v31  ;;  %v1689_v32 = vmov 0   ;;  %vm645_vm1 = vcmask 1040384   ;;  %vm1691_vm2 = vmmov 0  }
  0x28   :  { %1205 = vmatprep.mubr.msk.f32.mxu0 %vm45_vm0, %v1733_v2  ;;  %v1408_v6 = vpack.c.bf16 %v128_v5, %v127_v4  ;;  %v129_v7 = vld [vmem:[#allocation2 + $0x10] sm:$0xff]  ;;  %v130_v8 = vld [vmem:[#allocation2 + $0x18] sm:$0xff]  ;;  %v131_v10 = vld [vmem:[#allocation2 + $0x20] sm:$0xff]  ;;  %1605 = vset.pattern.permute.xlu0 %v1689_v32  ;;  %vm1019_vm3 = vcmask 1041408   ;;  %s1693_s1 = smov [#allocation7]  }
  0x29   :  { %1405 = vmatprep.subr.bf16.mxu0 %v1404_v3  ;;  %v1412_v9 = vpack.c.bf16 %v130_v8, %v129_v7  ;;  %v132_v11 = vld [vmem:[#allocation2 + $0x28] sm:$0xff]  ;;  %v1737_v12 = vld [vmem:[#allocation5 + $0x18] sm:$0xff]  ;;  %v133_v14 = vld [vmem:[#allocation2 + $0x30] sm:$0xff]  ;;  %s1040_s6 = sshll.u32 %s1693_s1, 4  ;;  %s1041_s6 = int_to_ptr.vmem [resolvable:$true] %s1040_s6 }
  0x2a   :  { %1407 = vmatpush3.bf16.msra.mxu0 %v1404_v3  ;;  %1409 = vmatprep.subr.bf16.mxu1 %v1408_v6  ;;  %v1416_v13 = vpack.c.bf16 %v132_v11, %v131_v10  ;;  %v134_v15 = vld [vmem:[#allocation2 + $0x38] sm:$0xff]  ;;  %v135_v17 = vld [vmem:[#allocation2 + $0x40] sm:$0xff]  ;;  %v136_v18 = vld [vmem:[#allocation2 + $0x48] sm:$0xff]  ;;  %s1656_s7 = scalar_lea.vmem %s1041_s6, 32  ;;  %p1661_p3 = scmp.lt.s32.totalorder %s1041_s6, %s1041_s6 }
  0x2b   :  { %1411 = vmatpush3.bf16.msra.mxu1 %v1408_v6  ;;  %v1420_v16 = vpack.c.bf16 %v134_v15, %v133_v14  ;;  %v1424_v19 = vpack.c.bf16 %v136_v18, %v135_v17  ;;  %v137_v20 = vld [vmem:[#allocation2 + $0x50] sm:$0xff]  ;;  %v138_v21 = vld [vmem:[#allocation2 + $0x58] sm:$0xff]  ;;  %v139_v23 = vld [vmem:[#allocation2 + $0x60] sm:$0xff]  ;;  %p1657_p2 = scmp.ne.s32.totalorder %s1041_s6, %s1656_s7  ;;  %p1662_p4 = scmp.lt.s32.totalorder %s1656_s7, %s1656_s7 }
  0x2c   :  { %1413 = vmatprep.subr.bf16.mxu1 %v1412_v9  ;;  %v1428_v22 = vpack.c.bf16 %v138_v21, %v137_v20  ;;  %v140_v24 = vld [vmem:[#allocation2 + $0x68] sm:$0xff]  ;;  %v141_v26 = vld [vmem:[#allocation2 + $0x70] sm:$0xff]  ;;  %v142_v27 = vld [vmem:[#allocation2 + $0x78] sm:$0xff] }
  0x2d   :  { %1206 = vmatmul.mubr.msk.f32.vlgmr.msra.gmra.mrb[0].mxu0 %vm45_vm0, %v1737_v12  ;;  %v1432_v25 = vpack.c.bf16 %v140_v24, %v139_v23  ;;  %v1436_v28 = vpack.c.bf16 %v142_v27, %v141_v26  ;;  %v571_v29 = vld [vmem:[#allocation5 + $0x20] sm:$0xff]  ;;  %v225_v30 = vld [vmem:[#allocation2 + $0x80] sm:$0xff]  ;;  %v227_v34 = vld [vmem:[#allocation2 + $0x90] sm:$0xff]  ;;  %p1663_p5 = por %p1662_p4, %p1661_p3 }
  0x2e   :  { %v226_v33 = vld [vmem:[#allocation2 + $0x88] sm:$0xff]  ;;  %v228_v35 = vld [vmem:[#allocation2 + $0x98] sm:$0xff]  ;;  %611 = vperm.xlu1 %1606, %v571_v29   ;;  %575 = vperm.xlu0 %1605, %v571_v29   ;;  %v572_v37 = vld [vmem:[#allocation5 + $0x28] sm:$0xff] }
  0x2f   :  { %1415 = vmatpush3.bf16.msra.mxu1 %v1412_v9  ;;  %v1440_v36 = vpack.c.bf16 %v226_v33, %v225_v30  ;;  %v1444_v38 = vpack.c.bf16 %v228_v35, %v227_v34  ;;  %v229_v39 = vld [vmem:[#allocation2 + $0xa0] sm:$0xff]  ;;  %v230_v40 = vld [vmem:[#allocation2 + $0xa8] sm:$0xff]  ;;  %v231_v42 = vld [vmem:[#allocation2 + $0xb0] sm:$0xff]  ;;  %p1664_p6 = pnand %p1663_p5, %p1657_p2 }
  0x30   :  { %1417 = vmatprep.subr.bf16.mxu1 %v1416_v13  ;;  %v1448_v41 = vpack.c.bf16 %v230_v40, %v229_v39  ;;  %v232_v43 = vld [vmem:[#allocation2 + $0xb8] sm:$0xff]  ;;  %v233_v45 = vld [vmem:[#allocation2 + $0xc0] sm:$0xff]  ;;  %v234_v46 = vld [vmem:[#allocation2 + $0xc8] sm:$0xff] }
  0x31   :  { %1441 = vmatprep.subr.bf16.mxu0 %v1440_v36  ;;  %v1452_v44 = vpack.c.bf16 %v232_v43, %v231_v42  ;;  %v1456_v47 = vpack.c.bf16 %v234_v46, %v233_v45  ;;  %v235_v48 = vld [vmem:[#allocation2 + $0xd0] sm:$0xff]  ;;  %v236_v49 = vld [vmem:[#allocation2 + $0xd8] sm:$0xff]  ;;  %v237_v51 = vld [vmem:[#allocation2 + $0xe0] sm:$0xff] }
  0x32   :  { %1443 = vmatpush3.bf16.msra.mxu0 %v1440_v36  ;;  %615 = vperm.xlu1 %1606, %v572_v37   ;;  %v1460_v50 = vpack.c.bf16 %v236_v49, %v235_v48  ;;  %v238_v52 = vld [vmem:[#allocation2 + $0xe8] sm:$0xff]  ;;  %v239_v56 = vld [vmem:[#allocation2 + $0xf0] sm:$0xff]  ;;  %v240_v57 = vld [vmem:[#allocation2 + $0xf8] sm:$0xff] }
  0x33   :  { %1419 = vmatpush3.bf16.msra.mxu1 %v1416_v13  ;;  %580 = vperm.xlu0 %1605, %v572_v37   ;;  %v1464_v53 = vpack.c.bf16 %v238_v52, %v237_v51  ;;  %v1468_v58 = vpack.c.bf16 %v240_v57, %v239_v56  ;;  %v1052_v59 = vld [vmem:[#allocation2 + $0x380] ss:$0 sm:$0xff]  ;;  %v399_v4 = vld [vmem:[#allocation2 + $0x108] sm:$0xff]  ;;  %v400_v9 = vld [vmem:[#allocation2 + $0x110] sm:$0xff] }
  0x34   :  { %1421 = vmatprep.subr.bf16.mxu1 %v1420_v16  ;;  %1445 = vmatprep.subr.bf16.mxu0 %v1444_v38  ;;  %v398_v3 = vld [vmem:[#allocation2 + $0x100] sm:$0xff]  ;;  %v401_v10 = vld [vmem:[#allocation2 + $0x118] sm:$0xff]  ;;  %v403_v14 = vld [vmem:[#allocation2 + $0x128] sm:$0xff] }
  0x35   :  { %v1476_v8 = vpack.c.bf16 %v399_v4, %v398_v3  ;;  %v1480_v11 = vpack.c.bf16 %v401_v10, %v400_v9  ;;  %v402_v13 = vld [vmem:[#allocation2 + $0x120] sm:$0xff]  ;;  %v404_v15 = vld [vmem:[#allocation2 + $0x130] sm:$0xff]  ;;  %v1692_v3 = vmov 0.0  }
  0x36   :  { %1447 = vmatpush3.bf16.msra.mxu0 %v1444_v38  ;;  %v406_v18 = vld [vmem:[#allocation2 + $0x140] sm:$0xff]  ;;  %v408_v21 = vld [vmem:[#allocation2 + $0x150] sm:$0xff] }
  0x37   :  { %1423 = vmatpush3.bf16.msra.mxu1 %v1420_v16  ;;  %1449 = vmatprep.subr.bf16.mxu0 %v1448_v41  ;;  %v405_v16 = vld [vmem:[#allocation2 + $0x138] sm:$0xff]  ;;  %v410_v24 = vld [vmem:[#allocation2 + $0x160] sm:$0xff]  ;;  %v412_v27 = vld [vmem:[#allocation2 + $0x170] sm:$0xff] }
  0x38   :  { %1425 = vmatprep.subr.bf16.mxu1 %v1424_v19  ;;  %1607 = vset.pattern.permute.xlu0 %v1688_v31  ;;  %v1488_v17 = vpack.c.bf16 %v405_v16, %v404_v15  ;;  %v1053_v32 = vld [vmem:[#allocation2 + $0x381] ss:$0 sm:$0xff] }
  0x3a   :  { %1451 = vmatpush3.bf16.msra.mxu0 %v1448_v41 }
  0x3b   :  { %1427 = vmatpush3.bf16.msra.mxu1 %v1424_v19  ;;  %1453 = vmatprep.subr.bf16.mxu0 %v1452_v44  ;;  %v407_v19 = vld [vmem:[#allocation2 + $0x148] sm:$0xff] }
  0x3c   :  { %1429 = vmatprep.subr.bf16.mxu1 %v1428_v22  ;;  %v1492_v20 = vpack.c.bf16 %v407_v19, %v406_v18 }
  0x3e   :  { %1455 = vmatpush3.bf16.msra.mxu0 %v1452_v44 }
  0x3f   :  { %1431 = vmatpush3.bf16.msra.mxu1 %v1428_v22  ;;  %1457 = vmatprep.subr.bf16.mxu0 %v1456_v47  ;;  %v409_v22 = vld [vmem:[#allocation2 + $0x158] sm:$0xff] }
  0x40   :  { %1433 = vmatprep.subr.bf16.mxu1 %v1432_v25  ;;  %v1496_v23 = vpack.c.bf16 %v409_v22, %v408_v21 }
  0x42   :  { %1459 = vmatpush3.bf16.msra.mxu0 %v1456_v47 }
  0x43   :  { %1435 = vmatpush3.bf16.msra.mxu1 %v1432_v25  ;;  %1461 = vmatprep.subr.bf16.mxu0 %v1460_v50  ;;  %v411_v25 = vld [vmem:[#allocation2 + $0x168] sm:$0xff] }
  0x44   :  { %1437 = vmatprep.subr.bf16.mxu1 %v1436_v28  ;;  %v1500_v26 = vpack.c.bf16 %v411_v25, %v410_v24  ;;  %v744_v24 = vld [vmem:[#allocation2 + $0x200] sm:$0xff]  ;;  %v745_v25 = vld [vmem:[#allocation2 + $0x208] sm:$0xff] }
  0x46   :  { %1463 = vmatpush3.bf16.msra.mxu0 %v1460_v50 }
  0x47   :  { %1439 = vmatpush3.bf16.msra.mxu1 %v1436_v28  ;;  %1465 = vmatprep.subr.bf16.mxu0 %v1464_v53  ;;  %v413_v28 = vld [vmem:[#allocation2 + $0x178] sm:$0xff] }
  0x48   :  { %v1504_v29 = vpack.c.bf16 %v413_v28, %v412_v27 }
  0x4a   :  { %1467 = vmatpush3.bf16.msra.mxu0 %v1464_v53 }
  0x4b   :  { %1469 = vmatprep.subr.bf16.mxu0 %v1468_v58 }
  0x4e   :  { %1471 = vmatpush3.bf16.msra.mxu0 %v1468_v58 }
  0xad   :  { %v1753_v30 = vpop.permute.xlu1 %611  ;;  %v1755_v31 = vpop.permute.xlu0 %575 }
  0xb1   :  { %v616_v38 = vpop.permute.xlu1 %615 }
  0xb2   :  { %v581_v39 = vpop.permute.xlu0 %580 }
 0x100   :  { %v1207_v54 = vpop.f32.mrb[0].mxu0 }
 0x101   :  { %v118_v55 = vpop.f32.mrb[1].mxu0 }
 0x102   :  { %1240 = vmatprep.mubr.f32.mxu1 %v118_v55 }
 0x103   :  { %1241 = vmatmul.mubr.f32.vlgmr.msra.gmra.mrb[0].mxu1 %v1207_v54 }
 0x104   :  { %1324 = vmatprep.mubr.msk.f32.mxu1 %vm45_vm0, %v1733_v2 }
 0x1d6   :  { %v1242_v60 = vpop.f32.mrb[0].mxu1 }
 0x1d7   :  { %v220_v61 = vadd.f32 %v1242_v60, %v1052_v59  ;;  %v214_v62 = vpop.f32.mrb[1].mxu1 }
 0x1d8   :  { %v215_v63 = vadd.f32 %v1052_v59, %v214_v62 }
 0x1d9   :  { %v1745_v1 = vmax.f32 %v220_v61, 0.0 }
 0x1da   :  { %v1743_v0 = vmax.f32 %v215_v63, 0.0  ;;  %v1690_v63 = vmov 0.0|0.0  }
 0x1dc   :  { %1275 = vmatprep.mubr.f32.mxu0 %v1743_v0  ;;  %v618_v4 = vadd.f32 %v1753_v30, %v1743_v0 }
 0x1dd   :  { %1276 = vmatmul.mubr.f32.vlgmr.msra.gmra.mrb[2].mxu0 %v1745_v1 }
 0x1de   :  { %1282 = vmatprep.mubr.msk.f32.mxu0 %vm45_vm0, %v1733_v2  ;;  %v1484_v2 = vpack.c.bf16 %v403_v14, %v402_v13 }
 0x2b0   :  { %v1277_v5 = vpop.f32.mrb[2].mxu0 }
 0x2b1   :  { %v307_v6 = vpop.f32.mrb[3].mxu0 }
 0x2b2   :  { %v1472_v7 = vpack.c.bf16 %v1277_v5, %v307_v6  ;;  %v621_v5 = vadd.f32 %v616_v38, %v1745_v1  ;;  %v586_v6 = vadd.f32 %v581_v39, %v1745_v1 }
 0x2b4   :  { %1473 = vmatprep.subr.bf16.mxu0 %v1472_v7 }
 0x2b5   :  { %1475 = vmatpush3.bf16.msra.mxu0 %v1472_v7  ;;  %v624_v7 = vmax.f32 %v618_v4, %v621_v5  ;;  %v750_v5 = vld [vmem:[#allocation2 + $0x230] sm:$0xff] }
 0x2b6   :  { %1477 = vmatprep.subr.bf16.mxu0 %v1476_v8 }
 0x2b7   :  { %v625_v9 = vrot.slane %v624_v7, 4 }
 0x2b8   :  { %1283 = vmatmul.mubr.msk.f32.vlgmr.msra.gmra.mrb[4].mxu0 %vm45_vm0, %v1737_v12 }
 0x2b9   :  { %1479 = vmatpush3.bf16.msra.mxu0 %v1476_v8  ;;  %v626_v13 = vmax.f32 %v624_v7, %v625_v9 }
 0x2ba   :  { %1481 = vmatprep.subr.bf16.mxu0 %v1480_v11 }
 0x2bb   :  { %v627_v18 = vrot.slane %v626_v13, 2 }
 0x2bd   :  { %1483 = vmatpush3.bf16.msra.mxu0 %v1480_v11  ;;  %v1056_v11 = vld [vmem:[#allocation2 + $0x382] ss:$0 sm:$0xff] }
 0x2be   :  { %1485 = vmatprep.subr.bf16.mxu0 %v1484_v2 }
 0x2c1   :  { %1487 = vmatpush3.bf16.msra.mxu0 %v1484_v2 }
 0x2c2   :  { %1489 = vmatprep.subr.bf16.mxu0 %v1488_v17 }
 0x2c5   :  { %1491 = vmatpush3.bf16.msra.mxu0 %v1488_v17 }
 0x2c6   :  { %1493 = vmatprep.subr.bf16.mxu0 %v1492_v20 }
 0x2c9   :  { %1495 = vmatpush3.bf16.msra.mxu0 %v1492_v20 }
 0x2ca   :  { %1497 = vmatprep.subr.bf16.mxu0 %v1496_v23 }
 0x2cd   :  { %1499 = vmatpush3.bf16.msra.mxu0 %v1496_v23 }
 0x2ce   :  { %1501 = vmatprep.subr.bf16.mxu0 %v1500_v26 }
 0x2d1   :  { %1503 = vmatpush3.bf16.msra.mxu0 %v1500_v26 }
 0x2d2   :  { %1505 = vmatprep.subr.bf16.mxu0 %v1504_v29 }
 0x2d5   :  { %1507 = vmatpush3.bf16.msra.mxu0 %v1504_v29 }
 0x2d6   :  { %1547 = vmatprep.subr.bf16.mxu0 %v1690_v63 }
 0x38b   :  { %v1284_v33 = vpop.f32.mrb[4].mxu0 }
 0x38c   :  { %v393_v34 = vadd.f32 %v1284_v33, %v1053_v32  ;;  %v387_v35 = vpop.f32.mrb[5].mxu0 }
 0x38d   :  { %v388_v36 = vadd.f32 %v1053_v32, %v387_v35  ;;  %v1515_v35 = vpack.c.bf16 %v745_v25, %v744_v24  ;;  %v754_v24 = vld [vmem:[#allocation2 + $0x250] sm:$0xff]  ;;  %v755_v25 = vld [vmem:[#allocation2 + $0x258] sm:$0xff] }
 0x38e   :  { %v397_v37 = vmax.f32 %v393_v34, 0.0  ;;  %v628_v34 = vmax.f32 %v626_v13, %v627_v18  ;;  %v752_v13 = vld [vmem:[#allocation2 + $0x240] sm:$0xff] }
 0x38f   :  { %v396_v40 = vmax.f32 %v388_v36, 0.0  ;;  %v728_v36 = vld [vmem:[#allocation2 + $0x180] sm:$0xff] }
 0x390   :  { %v587_v41 = vadd.f32 %v581_v39, %v397_v37  ;;  %v622_v42 = vadd.f32 %v616_v38, %v397_v37  ;;  %v652_v20 = vadd.f32 %v397_v37, %v1745_v1 }
 0x391   :  { %v584_v43 = vadd.f32 %v1755_v31, %v396_v40  ;;  %v619_v44 = vadd.f32 %v1753_v30, %v396_v40  ;;  %1317 = vmatprep.mubr.f32.mxu0 %v396_v40  ;;  %v651_v23 = vadd.f32 %v396_v40, %v1743_v0 }
 0x392   :  { %1318 = vmatmul.mubr.f32.vlgmr.msra.gmra.mrb[6].mxu0 %v397_v37 }
 0x393   :  { %v596_v45 = vmax.f32 %v584_v43, %v587_v41  ;;  %v631_v46 = vmax.f32 %v619_v44, %v622_v42  ;;  %1366 = vmatprep.mubr.msk.f32.mxu0 %vm1691_vm2, %v1692_v3  ;;  %v729_v41 = vld [vmem:[#allocation2 + $0x188] sm:$0xff]  ;;  %v746_v44 = vld [vmem:[#allocation2 + $0x210] sm:$0xff] }
 0x395   :  { %v597_v47 = vrot.slane %v596_v45, 4  ;;  %v632_v48 = vrot.slane %v631_v46, 4 }
 0x397   :  { %v598_v49 = vmax.f32 %v596_v45, %v597_v47  ;;  %v633_v50 = vmax.f32 %v631_v46, %v632_v48  ;;  %v730_v46 = vld [vmem:[#allocation2 + $0x190] sm:$0xff]  ;;  %v629_v47 = vrot.slane %v628_v34, 1 }
 0x399   :  { %v599_v51 = vrot.slane %v598_v49, 2  ;;  %v634_v52 = vrot.slane %v633_v50, 2 }
 0x39b   :  { %v600_v53 = vmax.f32 %v598_v49, %v599_v51  ;;  %v635_v54 = vmax.f32 %v633_v50, %v634_v52  ;;  %v748_v51 = vld [vmem:[#allocation2 + $0x220] sm:$0xff]  ;;  %v749_v52 = vld [vmem:[#allocation2 + $0x228] sm:$0xff] }
 0x39d   :  { %v601_v55 = vrot.slane %v600_v53, 1  ;;  %v636_v56 = vrot.slane %v635_v54, 1 }
 0x39f   :  { %v602_v57 = vmax.f32 %v600_v53, %v601_v55  ;;  %v637_v58 = vmax.f32 %v635_v54, %v636_v56  ;;  %v1523_v56 = vpack.c.bf16 %v749_v52, %v748_v51  ;;  %v844_v52 = vld [vmem:[#allocation2 + $0x2c0] sm:$0xff] }
 0x3a1   :  { %v1760_v59 = vsel %vm645_vm1, %v602_v57, %v637_v58  ;;  %v732_v57 = vld [vmem:[#allocation2 + $0x1a0] sm:$0xff]  ;;  %v733_v58 = vld [vmem:[#allocation2 + $0x1a8] sm:$0xff] }
 0x465   :  { %v1319_v60 = vpop.f32.mrb[6].mxu0 }
 0x466   :  { %v480_v61 = vpop.f32.mrb[7].mxu0 }
 0x467   :  { %v1508_v62 = vpack.c.bf16 %v1319_v60, %v480_v61  ;;  %v630_v60 = vmax.f32 %v628_v34, %v629_v47  ;;  %v841_v47 = vld [vmem:[#allocation2 + $0x2a8] sm:$0xff] }
 0x469   :  { %1509 = vmatprep.subr.bf16.mxu1 %v1508_v62 }
 0x46a   :  { %1511 = vmatpush3.bf16.msra.mxu1 %v1508_v62 }
 0x46b   :  { %1512 = vmatprep.subr.bf16.mxu1 %v1690_v63 }
 0x46d   :  { %1325 = vmatmul.mubr.msk.f32.vlgmr.msra.gmra.mrb[2].mxu1 %vm45_vm0, %v1737_v12  ;;  %v583_v12 = vadd.f32 %v1755_v31, %v1743_v0  ;;  %v747_v0 = vld [vmem:[#allocation2 + $0x218] sm:$0xff] }
 0x46e   :  { %1331 = vmatprep.mubr.msk.f32.mxu1 %vm1691_vm2, %v1692_v3 }
 0x46f   :  { %v589_v8 = vmax.f32 %v583_v12, %v586_v6  ;;  %v751_v12 = vld [vmem:[#allocation2 + $0x238] sm:$0xff] }
 0x470   :  { %v1527_v9 = vpack.c.bf16 %v751_v12, %v750_v5  ;;  %v850_v5 = vld [vmem:[#allocation2 + $0x2f0] sm:$0xff]  ;;  %v851_v12 = vld [vmem:[#allocation2 + $0x2f8] sm:$0xff] }
 0x471   :  { %v590_v10 = vrot.slane %v589_v8, 4 }
 0x473   :  { %v591_v14 = vmax.f32 %v589_v8, %v590_v10  ;;  %v1525_v8 = vpack.c.bf16 %v733_v58, %v732_v57  ;;  %v734_v10 = vld [vmem:[#allocation2 + $0x1b0] sm:$0xff] }
 0x475   :  { %v592_v21 = vrot.slane %v591_v14, 2 }
 0x477   :  { %v593_v42 = vmax.f32 %v591_v14, %v592_v21  ;;  %v753_v14 = vld [vmem:[#allocation2 + $0x248] sm:$0xff]  ;;  %v736_v21 = vld [vmem:[#allocation2 + $0x1c0] sm:$0xff] }
 0x479   :  { %v594_v48 = vrot.slane %v593_v42, 1 }
 0x47b   :  { %v595_v61 = vmax.f32 %v593_v42, %v594_v48  ;;  %v759_v42 = vld [vmem:[#allocation2 + $0x278] sm:$0xff] }
 0x540   :  { %v1326_v2 = vpop.f32.mrb[2].mxu1 }
 0x541   :  { %v566_v15 = vadd.f32 %v1326_v2, %v1056_v11  ;;  %v560_v16 = vpop.f32.mrb[3].mxu1 }
 0x542   :  { %v561_v17 = vadd.f32 %v1056_v11, %v560_v16  ;;  %v735_v11 = vld [vmem:[#allocation2 + $0x1b8] sm:$0xff]  ;;  %v646_v16 = vsel %vm645_vm1, %v595_v61, %v630_v60  ;;  %v848_v61 = vld [vmem:[#allocation2 + $0x2e0] sm:$0xff] }
 0x543   :  { %v570_v19 = vmax.f32 %v566_v15, 0.0  ;;  %v1529_v18 = vpack.c.bf16 %v735_v11, %v734_v10  ;;  %v931_v11 = vld [vmem:[#allocation2 + $0x318] sm:$0xff] }
 0x544   :  { %v569_v22 = vmax.f32 %v561_v17, 0.0  ;;  %v649_v17 = vadd.f32 %v1760_v59, %v646_v16  ;;  %v935_v16 = vld [vmem:[#allocation2 + $0x338] sm:$0xff] }
 0x545   :  { %v588_v26 = vadd.f32 %v581_v39, %v570_v19  ;;  %v623_v27 = vadd.f32 %v616_v38, %v570_v19  ;;  %v654_v28 = vadd.f32 %v652_v20, %v570_v19  ;;  %v44_v38 = vld [vmem:[#allocation5 + $0x30] sm:$0x3]  ;;  %v1517_v39 = vpack.c.bf16 %v729_v41, %v728_v36  ;;  %v741_v36 = vld [vmem:[#allocation2 + $0x1e8] sm:$0xff]  ;;  %v758_v41 = vld [vmem:[#allocation2 + $0x270] sm:$0xff] }
 0x546   :  { %v585_v29 = vadd.f32 %v1755_v31, %v569_v22  ;;  %v620_v32 = vadd.f32 %v1753_v30, %v569_v22  ;;  %v653_v33 = vadd.f32 %v651_v23, %v569_v22  ;;  %v1519_v31 = vpack.c.bf16 %v747_v0, %v746_v44  ;;  %v731_v30 = vld [vmem:[#allocation2 + $0x198] sm:$0xff]  ;;  %v737_v22 = vld [vmem:[#allocation2 + $0x1c8] sm:$0xff] }
 0x547   :  { %v1521_v55 = vpack.c.bf16 %v731_v30, %v730_v46  ;;  %v1531_v20 = vpack.c.bf16 %v753_v14, %v752_v13  ;;  %v743_v44 = vld [vmem:[#allocation2 + $0x1f8] sm:$0xff]  ;;  %v840_v30 = vld [vmem:[#allocation2 + $0x2a0] sm:$0xff]  ;;  %v933_v14 = vld [vmem:[#allocation2 + $0x328] sm:$0xff] }
 0x548   :  { %v603_v1 = vmax.f32 %v585_v29, %v588_v26  ;;  %v638_v37 = vmax.f32 %v620_v32, %v623_v27  ;;  %v1513_v43 = vpack.c.bf16 %v654_v28, %v653_v33  ;;  %v1533_v26 = vpack.c.bf16 %v737_v22, %v736_v21  ;;  %v738_v28 = vld [vmem:[#allocation2 + $0x1d0] sm:$0xff]  ;;  %v739_v29 = vld [vmem:[#allocation2 + $0x1d8] sm:$0xff]  ;;  %v756_v32 = vld [vmem:[#allocation2 + $0x260] sm:$0xff] }
 0x549   :  { %v1535_v27 = vpack.c.bf16 %v755_v25, %v754_v24  ;;  %v757_v33 = vld [vmem:[#allocation2 + $0x268] sm:$0xff]  ;;  %v1537_v59 = vpack.c.bf16 %v739_v29, %v738_v28  ;;  %v1554_v48 = vpack.c.bf16 %v841_v47, %v840_v30  ;;  %v938_v21 = vld [vmem:[#allocation2 + $0x350] sm:$0xff]  ;;  %v939_v22 = vld [vmem:[#allocation2 + $0x358] sm:$0xff] }
 0x54a   :  { %v604_v40 = vrot.slane %v603_v1, 4  ;;  %v639_v45 = vrot.slane %v638_v37, 4  ;;  %1514 = vmatpush3.bf16.msra.mxu1 %v1513_v43  ;;  %v1539_v34 = vpack.c.bf16 %v757_v33, %v756_v32  ;;  %v742_v43 = vld [vmem:[#allocation2 + $0x1f0] sm:$0xff]  ;;  %v940_v24 = vld [vmem:[#allocation2 + $0x360] sm:$0xff]  ;;  %v941_v25 = vld [vmem:[#allocation2 + $0x368] sm:$0xff] }
 0x54b   :  { %1516 = vmatprep.subr.bf16.mxu1 %v1515_v35  ;;  %v740_v35 = vld [vmem:[#allocation2 + $0x1e0] sm:$0xff]  ;;  %v1545_v0 = vpack.c.bf16 %v743_v44, %v742_v43 }
 0x54c   :  { %v605_v49 = vmax.f32 %v603_v1, %v604_v40  ;;  %v640_v50 = vmax.f32 %v638_v37, %v639_v45  ;;  %v1541_v1 = vpack.c.bf16 %v741_v36, %v740_v35  ;;  %v1543_v37 = vpack.c.bf16 %v759_v42, %v758_v41  ;;  %v836_v40 = vld [vmem:[#allocation2 + $0x280] sm:$0xff]  ;;  %v837_v45 = vld [vmem:[#allocation2 + $0x288] sm:$0xff]  ;;  %v943_v35 = vld [vmem:[#allocation2 + $0x378] sm:$0xff] }
 0x54d   :  { %1332 = vmatmul.mubr.msk.f32.vlgmr.msra.gmra.mrb[4].mxu1 %vm45_vm0, %v44_v38  ;;  %v838_v38 = vld [vmem:[#allocation2 + $0x290] sm:$0xff]  ;;  %v1060_v28 = vld [vmem:[#allocation2 + $0x383] ss:$0 sm:$0xff]  ;;  %v1061_v41 = vld [vmem:[#allocation2 + $0x384] ss:$0 sm:$0xff] }
 0x54e   :  { %v606_v53 = vrot.slane %v605_v49, 2  ;;  %v641_v54 = vrot.slane %v640_v50, 2  ;;  %1518 = vmatpush3.bf16.msra.mxu1 %v1517_v39  ;;  %v1548_v39 = vpack.c.bf16 %v837_v45, %v836_v40  ;;  %v1062_v44 = vld [vmem:[#allocation2 + $0x385] ss:$0 sm:$0xff] }
 0x54f   :  { %1520 = vmatprep.subr.bf16.mxu1 %v1519_v31  ;;  %v839_v31 = vld [vmem:[#allocation2 + $0x298] sm:$0xff] }
 0x550   :  { %v607_v62 = vmax.f32 %v605_v49, %v606_v53  ;;  %v642_v4 = vmax.f32 %v640_v50, %v641_v54  ;;  %1549 = vmatpush3.bf16.msra.mxu0 %v1548_v39  ;;  %v1551_v46 = vpack.c.bf16 %v839_v31, %v838_v38  ;;  %v842_v49 = vld [vmem:[#allocation2 + $0x2b0] sm:$0xff]  ;;  %v843_v50 = vld [vmem:[#allocation2 + $0x2b8] sm:$0xff]  ;;  %v845_v53 = vld [vmem:[#allocation2 + $0x2c8] sm:$0xff] }
 0x551   :  { %1550 = vmatprep.subr.bf16.mxu0 %v1690_v63  ;;  %v1557_v51 = vpack.c.bf16 %v843_v50, %v842_v49  ;;  %v1560_v54 = vpack.c.bf16 %v845_v53, %v844_v52 }
 0x552   :  { %v608_v6 = vrot.slane %v607_v62, 1  ;;  %v643_v7 = vrot.slane %v642_v4, 1  ;;  %1522 = vmatpush3.bf16.msra.mxu1 %v1521_v55  ;;  %v846_v55 = vld [vmem:[#allocation2 + $0x2d0] sm:$0xff] }
 0x553   :  { %1524 = vmatprep.subr.bf16.mxu1 %v1523_v56  ;;  %v847_v56 = vld [vmem:[#allocation2 + $0x2d8] sm:$0xff] }
 0x554   :  { %v609_v2 = vmax.f32 %v607_v62, %v608_v6  ;;  %v644_v15 = vmax.f32 %v642_v4, %v643_v7  ;;  %1552 = vmatpush3.bf16.msra.mxu0 %v1551_v46  ;;  %v1563_v57 = vpack.c.bf16 %v847_v56, %v846_v55  ;;  %v849_v62 = vld [vmem:[#allocation2 + $0x2e8] sm:$0xff]  ;;  %v1569_v6 = vpack.c.bf16 %v851_v12, %v850_v5  ;;  %v928_v7 = vld [vmem:[#allocation2 + $0x300] sm:$0xff] }
 0x555   :  { %1553 = vmatprep.subr.bf16.mxu0 %v1690_v63  ;;  %v1566_v4 = vpack.c.bf16 %v849_v62, %v848_v61 }
 0x556   :  { %1526 = vmatpush3.bf16.msra.mxu1 %v1525_v8  ;;  %v648_v19 = vsel %vm645_vm1, %v609_v2, %v644_v15  ;;  %v929_v8 = vld [vmem:[#allocation2 + $0x308] sm:$0xff]  ;;  %v934_v15 = vld [vmem:[#allocation2 + $0x330] sm:$0xff] }
 0x557   :  { %1528 = vmatprep.subr.bf16.mxu1 %v1527_v9  ;;  %v650_v23 = vadd.f32 %v649_v17, %v648_v19  ;;  %v930_v9 = vld [vmem:[#allocation2 + $0x310] sm:$0xff]  ;;  %v1572_v10 = vpack.c.bf16 %v929_v8, %v928_v7  ;;  %v1581_v17 = vpack.c.bf16 %v935_v16, %v934_v15  ;;  %v937_v19 = vld [vmem:[#allocation2 + $0x348] sm:$0xff] }
 0x558   :  { %1555 = vmatpush3.bf16.msra.mxu0 %v1554_v48  ;;  %v1575_v13 = vpack.c.bf16 %v931_v11, %v930_v9 }
 0x559   :  { %1556 = vmatprep.subr.bf16.mxu0 %v1690_v63 }
 0x55a   :  { %1530 = vmatpush3.bf16.msra.mxu1 %v1529_v18  ;;  %v936_v18 = vld [vmem:[#allocation2 + $0x340] sm:$0xff] }
 0x55b   :  { %1532 = vmatprep.subr.bf16.mxu1 %v1531_v20  ;;  %v1584_v20 = vpack.c.bf16 %v937_v19, %v936_v18 }
 0x55c   :  { %1558 = vmatpush3.bf16.msra.mxu0 %v1557_v51 }
 0x55d   :  { %1559 = vmatprep.subr.bf16.mxu0 %v1690_v63 }
 0x55e   :  { %1534 = vmatpush3.bf16.msra.mxu1 %v1533_v26  ;;  %v1590_v26 = vpack.c.bf16 %v941_v25, %v940_v24 }
 0x55f   :  { %1536 = vmatprep.subr.bf16.mxu1 %v1535_v27 }
 0x560   :  { %1561 = vmatpush3.bf16.msra.mxu0 %v1560_v54 }
 0x561   :  { %1562 = vmatprep.subr.bf16.mxu0 %v1690_v63 }
 0x562   :  { %1538 = vmatpush3.bf16.msra.mxu1 %v1537_v59 }
 0x563   :  { %1540 = vmatprep.subr.bf16.mxu1 %v1539_v34  ;;  %v942_v34 = vld [vmem:[#allocation2 + $0x370] sm:$0xff] }
 0x564   :  { %1564 = vmatpush3.bf16.msra.mxu0 %v1563_v57  ;;  %v1593_v36 = vpack.c.bf16 %v943_v35, %v942_v34 }
 0x565   :  { %1565 = vmatprep.subr.bf16.mxu0 %v1690_v63 }
 0x566   :  { %1542 = vmatpush3.bf16.msra.mxu1 %v1541_v1 }
 0x567   :  { %1544 = vmatprep.subr.bf16.mxu1 %v1543_v37 }
 0x568   :  { %1567 = vmatpush3.bf16.msra.mxu0 %v1566_v4 }
 0x569   :  { %1568 = vmatprep.subr.bf16.mxu0 %v1690_v63 }
 0x56a   :  { %1546 = vmatpush3.bf16.msra.mxu1 %v1545_v0 }
 0x56b   :  { %1571 = vmatprep.subr.bf16.mxu1 %v1690_v63 }
 0x56c   :  { %1570 = vmatpush3.bf16.msra.mxu0 %v1569_v6 }
 0x620   :  { %v724_v58 = vpop.f32.mrb[4].mxu1 }
 0x621   :  { %v1333_v60 = vpop.f32.mrb[5].mxu1  ;;  %829 = vmatprep.mubr.f32.mxu1 %v724_v58 }
 0x622   :  { %830 = vmatmul.mubr.f32.vlgmr.msra.gmra.mrb[6].mxu1 %v650_v23  ;;  %v1587_v23 = vpack.c.bf16 %v939_v22, %v938_v21 }
 0x623   :  { %1401 = vmatprep.mubr.msk.f32.mxu1 %vm1691_vm2, %v1692_v3  ;;  %1573 = vmatpush3.bf16.msra.mxu1 %v1572_v10  ;;  %v932_v3 = vld [vmem:[#allocation2 + $0x320] sm:$0xff] }
 0x624   :  { %1574 = vmatprep.subr.bf16.mxu1 %v1690_v63  ;;  %v1578_v2 = vpack.c.bf16 %v933_v14, %v932_v3 }
 0x627   :  { %1576 = vmatpush3.bf16.msra.mxu1 %v1575_v13 }
 0x628   :  { %1577 = vmatprep.subr.bf16.mxu1 %v1690_v63 }
 0x62b   :  { %1579 = vmatpush3.bf16.msra.mxu1 %v1578_v2 }
 0x62c   :  { %1580 = vmatprep.subr.bf16.mxu1 %v1690_v63 }
 0x62f   :  { %1582 = vmatpush3.bf16.msra.mxu1 %v1581_v17 }
 0x630   :  { %1583 = vmatprep.subr.bf16.mxu1 %v1690_v63 }
 0x633   :  { %1585 = vmatpush3.bf16.msra.mxu1 %v1584_v20 }
 0x634   :  { %1586 = vmatprep.subr.bf16.mxu1 %v1690_v63 }
 0x637   :  { %1588 = vmatpush3.bf16.msra.mxu1 %v1587_v23 }
 0x638   :  { %1589 = vmatprep.subr.bf16.mxu1 %v1690_v63 }
 0x63b   :  { %1591 = vmatpush3.bf16.msra.mxu1 %v1590_v26 }
 0x63c   :  { %1592 = vmatprep.subr.bf16.mxu1 %v1690_v63 }
 0x63f   :  { %1594 = vmatpush3.bf16.msra.mxu1 %v1593_v36 }
 0x6f5   :  { %v1164_v27 = vpop.f32.mrb[6].mxu1 }
 0x6f6   :  { %v1165_v29 = vpop.f32.mrb[7].mxu1 }
 0x6f7   :  { %v1166_v32 = vadd.f32 %v1165_v29, %v1164_v27 }
 0x6f9   :  { %v832_v33 = vadd.f32 %v1166_v32, %v1060_v28 }
 0x6fb   :  { %v835_v59 = vmax.f32 %v832_v33, 0.0 }
 0x6fd   :  { %1367 = vmatmul.mubr.f32.vlgmr.msra.gmra.mrb[8].mxu0 %v835_v59 }
 0x7d0   :  { %v923_v42 = vpop.f32.mrb[8].mxu0 }
 0x7d1   :  { %v924_v1 = vadd.f32 %v1061_v41, %v923_v42  ;;  %v1368_v37 = vpop.f32.mrb[9].mxu0 }
 0x7d3   :  { %v927_v43 = vmax.f32 %v924_v1, 0.0 }
 0x7d5   :  { %1402 = vmatmul.mubr.f32.vlgmr.msra.gmra.mrb[8].mxu1 %v927_v43 }
 0x8a8   :  { %v1015_v0 = vpop.f32.mrb[8].mxu1 }
 0x8a9   :  { %v1016_v63 = vadd.f32 %v1062_v44, %v1015_v0  ;;  %v1403_v40 = vpop.f32.mrb[9].mxu1 }
 0x8ab   :  { %v1020_v45 = vsel %vm1019_vm3, %v1016_v63, -inf }
 0x8ac   :  { %1021 = vmax.xlane.f32.xlu0 %v1020_v45 }
 0x939   :  { %v1022_v38 = vpop.xlane.xlu0 %1021 }
 0x93a   :  { %v1023_v39 = vsub.f32 %v1016_v63, %v1022_v38 }
 0x93c   :  { %v1024_v31 = vmul.f32 1.442695, %v1023_v39 }
 0x93e   :  { %1608 = vpow2.f32 %v1024_v31 }
 0x948   :  { %v1609_v46 = vpop.eup %1608 }
 0x949   :  { %v1026_v30 = vsel %vm1019_vm3, %v1609_v46, 0.0 }
 0x94a   :  { %1027 = vadd.xlane.f32.xlu1 %v1026_v30 }
 0x9d7   :  { %v1028_v47 = vpop.xlane.xlu1 %1027 }
 0x9d8   :  { %1610 = vlog2.f32 %v1028_v47 }
 0x9e2   :  { %v1611_v48 = vpop.eup %1610 }
 0x9e3   :  { %v1030_v49 = vmul.f32 0.6931472, %v1611_v48 }
 0x9e5   :  { %v1031_v50 = vadd.f32 %v1030_v49, %v1022_v38 }
 0x9e7   :  { %v1032_v51 = vsub.f32 %v1016_v63, %v1031_v50 }
 0x9e9   :  { %1033 = vst [vmem:[#allocation7] sm:$0x3] %v1032_v51 }
 0x9ea   :  { %1667 = shalt.err (!%p1664_p6)
}
 0x9eb   :  { %s1668_s10 = scalar_lea.hbm %s1815_s2, 32 }
 0x9ec   :  { %p1669_p7 = scmp.ne.s32.totalorder %s1815_s2, %s1668_s10  ;;  %p1672_p8 = scmp.lt.u32.totalorder %s1668_s10, %s1815_s2 }
 0x9ee   :  { %p1674_p9 = pnand %p1672_p8, %p1669_p7 }
 0x9f0   :  { %1677 = shalt.err (!%p1674_p9)
}
 0x9f1   :  { %1043 = dma.vmem_to_hbm [thread:$0]  %s1041_s6, 32, %s1815_s2, [#allocation4]  }
 0x9f2   :  { %1682 = dma.done.wait [#allocation4], 32  }
 0x9f3   :  { %1683 = vsyncadd [#allocation4], 4294967264 }
 0x9f4   :  { %1047 = vsyncpa [#allocation3], 1 }
 0x9f5   :  { %1048 = vsyncpa [#allocation6], 1 }
 0x9f6   :  { %1049 = vsyncpa [#allocation4], 1 }

</bundles_post_ra>
